<compile_context>
chip_gen: v7x
topology: tpu7x:2x2x1
jax: 0.10.0
libtpu: 0.0.40
codegen_flags: <defaults>
</compile_context>

<pallas_src>
import functools

import jax
import jax.numpy as jnp
from jax import lax
from jax.experimental import pallas as pl
from jax.experimental.pallas import tpu as pltpu


def _round_up(x, m):
    return ((x + m - 1) // m) * m


def _odefunc_att_kernel(z_ref, w1_ref, b1_ref, w2_ref, b2_ref, wq_ref, bq_ref,
                        rq_ref, dz_ref, da_ref, dc_ref):
    """Per-block kernel over `tn` trajectories.

    dz = tanh(z @ W1 + b1) @ W2 + b2                               (MXU)
    s  = <raw_query @ Wq + bq, z>, computed algebraically as
         <raw_query, z @ Wq^T> + <bq, z>   (no q tensor, no (tn*T,D) matmul)
    da = exp(tanh(s))                                              (VPU+XLU+EUP)
    dc = da * z broadcast over time, emitted as a lane-dense (tn, T*D) slab
    """
    z = z_ref[...].astype(jnp.float32)                             # (tn, D)
    tn, D = z.shape
    T = rq_ref.shape[1]                                            # n_tp (static)

    # ---- get_ode_gradient_nn: dz = MLP(z) (torch.squeeze is identity here) ----
    h = jnp.tanh(
        jnp.dot(z, w1_ref[...], preferred_element_type=jnp.float32) + b1_ref[...])
    dz = jnp.dot(h, w2_ref[...], preferred_element_type=jnp.float32) + b2_ref[...]
    dz_ref[...] = dz.astype(dz_ref.dtype)

    # ---- attention scores without materializing q = rq @ Wq + bq ----
    # v[n, e] = sum_d Wq[e, d] * z[n, d]  == (z @ Wq^T)[n, e]
    v = lax.dot_general(z, wq_ref[...],
                        dimension_numbers=(((1,), (1,)), ((), ())),
                        preferred_element_type=jnp.float32)        # (tn, D)
    c = jnp.sum(z * bq_ref[...], axis=-1, keepdims=True)           # (tn, 1)

    rq = rq_ref[...].astype(jnp.float32)                           # (tn, T, D)
    s = jnp.sum(rq * v[:, None, :], axis=-1) + c                   # (tn, T)
    da = jnp.exp(jnp.tanh(s))                                      # (tn, T) f32

    # ---- dc = da * z broadcast over time, as a lane-dense slab (T*D lanes) ----
    dc = (da[:, :, None] * z[:, None, :]).reshape(tn, T * D)       # (tn, T*D)

    da_ref[...] = da.astype(da_ref.dtype)
    dc_ref[...] = dc.astype(dc_ref.dtype)


@functools.partial(jax.jit,
                   static_argnames=("total_n_tp", "block_n",
                                    "vmem_budget_bytes", "query_in_bf16"))
def odefunc_att_forward(z, w1, b1, w2, b2, wq, bq, raw_query, *,
                        total_n_tp, block_n=256,
                        vmem_budget_bytes=32 * 1024 * 1024,
                        query_in_bf16=False):
    """Pallas wrapper: VMEM-aware tiling over n_traj, weights broadcast per block."""
    N, D = z.shape
    _, T, _ = raw_query.shape
    H = w1.shape[1]
    assert raw_query.shape == (N, T, D) and T <= total_n_tp

    # ---- VMEM-aware trajectory-block selection (safe for v7x's 64 MiB VMEM) ----
    # double-buffered per-row f32 traffic: z, raw_query (in) + dz, da, dc (out)
    bytes_per_row = 2 * 4 * (D + T * D + D + T + T * D)
    cap = max(8, (vmem_budget_bytes // max(bytes_per_row, 1)) // 8 * 8)
    tn = min(block_n, cap, _round_up(N, 8))
    tn = max(8, tn - tn % 8)
    # v7x has 2 TensorCores: keep >= 2 grid blocks whenever there is enough work.
    if _round_up(N, tn) // tn < 2 and _round_up(N, 8) >= 16:
        tn = max(8, _round_up((_round_up(N, 8) + 1) // 2, 8))
    N_pad = _round_up(N, tn)
    grid = (N_pad // tn,)

    # ---- pad trajectories to a multiple of tn (sliced off after the call) ----
    if N_pad != N:
        z_p = jnp.zeros((N_pad, D), z.dtype).at[:N].set(z)
        rq_p = jnp.zeros((N_pad, T, D), raw_query.dtype).at[:N].set(raw_query)
    else:
        z_p, rq_p = z, raw_query
    if query_in_bf16:
        rq_p = rq_p.astype(jnp.bfloat16)   # halves the dominant HBM read stream

    out_shapes = (
        jax.ShapeDtypeStruct((N_pad, D), z.dtype),        # dz
        jax.ShapeDtypeStruct((N_pad, T), z.dtype),        # da (computed cols only)
        jax.ShapeDtypeStruct((N_pad, T * D), z.dtype),    # dc lane-dense slab
    )

    dz, da_k, dc_k = pl.pallas_call(
        _odefunc_att_kernel,
        out_shape=out_shapes,
        grid=grid,
        in_specs=[
            pl.BlockSpec((tn, D), lambda i: (i, 0)),        # z
            pl.BlockSpec((D, H), lambda i: (0, 0)),         # w1
            pl.BlockSpec((1, H), lambda i: (0, 0)),         # b1
            pl.BlockSpec((H, D), lambda i: (0, 0)),         # w2
            pl.BlockSpec((1, D), lambda i: (0, 0)),         # b2
            pl.BlockSpec((D, D), lambda i: (0, 0)),         # wq (self.weight)
            pl.BlockSpec((1, D), lambda i: (0, 0)),         # bq
            pl.BlockSpec((tn, T, D), lambda i: (i, 0, 0)),  # raw_query
        ],
        out_specs=(
            pl.BlockSpec((tn, D), lambda i: (i, 0)),
            pl.BlockSpec((tn, T), lambda i: (i, 0)),
            pl.BlockSpec((tn, T * D), lambda i: (i, 0)),
        ),
        compiler_params=pltpu.CompilerParams(
            dimension_semantics=("parallel",),
            vmem_limit_bytes=min(vmem_budget_bytes + (16 << 20), 64 << 20),
        ),
    )(z_p, w1, b1, w2, b2, wq, bq, rq_p)

    # ---- wrapper-side layout plumbing back to the module's output shapes ----
    dz = dz[:N]
    pad_t = total_n_tp - T
    # Zero tail written once here, not per grid step / per solver eval in-kernel.
    # TODO(synk): in a real ODE-solver loop, keep a persistently pre-zeroed
    #             da/dc buffer and reuse it via input_output_aliases instead of
    #             re-padding every call.
    da = jnp.pad(da_k[:N], ((0, 0), (0, pad_t)))[:, :, None]          # (N, total_n_tp, 1)
    dc = jnp.pad(dc_k[:N].reshape(N, T, D), ((0, 0), (0, pad_t), (0, 0)))
    return dz, da, dc


def reference_forward(z, w1, b1, w2, b2, wq, bq, raw_query, total_n_tp):
    """Pure-JAX reference matching the PyTorch forward semantics."""
    N, D = z.shape
    T = raw_query.shape[1]
    query = raw_query @ wq + bq                                  # self.weight(query)
    dz = jnp.tanh(z @ w1 + b1) @ w2 + b2
    s = jnp.einsum("ntd,nd->nt", query, z)
    da = jnp.exp(jnp.tanh(s))[:, :, None]                        # (N, T, 1)
    dc = da * z[:, None, :]                                      # (N, T, D)
    da = jnp.concatenate([da, jnp.zeros((N, total_n_tp - T, 1), z.dtype)], axis=1)
    dc = jnp.concatenate([dc, jnp.zeros((N, total_n_tp - T, D), z.dtype)], axis=1)
    return dz, da, dc


if __name__ == "__main__":
    # Small shapes consistent with the module; N=20 exercises the padding path
    # and yields a 2-block grid (v7x both-TensorCore path).
    n_traj, latent_dim, hidden_dim = 20, 32, 64
    n_tp, total_n_tp = 8, 16

    key = jax.random.PRNGKey(0)
    kz, kq, k1, k2, k3, k4, kw, kb = jax.random.split(key, 8)

    # State z (first element of `states`).
    z = jax.random.normal(kz, (n_traj, latent_dim), jnp.float32)

    # ode_func_net parameters (Linear->tanh->Linear), stored as (in, out)
    # matrices so the kernel computes x @ W + b.
    w1 = jax.random.normal(k1, (latent_dim, hidden_dim), jnp.float32) * 0.1
    b1 = jax.random.normal(k2, (1, hidden_dim), jnp.float32) * 0.1
    w2 = jax.random.normal(k3, (hidden_dim, latent_dim), jnp.float32) * 0.1
    b2 = jax.random.normal(k4, (1, latent_dim), jnp.float32) * 0.1

    # self.weight (query projection) parameters — folded into the kernel algebraically.
    wq = jax.random.normal(kw, (latent_dim, latent_dim), jnp.float32) * 0.1
    bq = jax.random.normal(kb, (1, latent_dim), jnp.float32) * 0.1
    raw_query = jax.random.normal(kq, (n_traj, n_tp, latent_dim), jnp.float32)

    dz, da, dc = odefunc_att_forward(
        z, w1, b1, w2, b2, wq, bq, raw_query, total_n_tp=total_n_tp)
    jax.block_until_ready((dz, da, dc))

    # Correctness check against the pure-JAX reference of the PyTorch forward.
    r_dz, r_da, r_dc = reference_forward(
        z, w1, b1, w2, b2, wq, bq, raw_query, total_n_tp)
    assert dz.shape == (n_traj, latent_dim)
    assert da.shape == (n_traj, total_n_tp, 1)
    assert dc.shape == (n_traj, total_n_tp, latent_dim)
    assert jnp.allclose(dz, r_dz, atol=2e-5, rtol=2e-5)
    assert jnp.allclose(da, r_da, atol=2e-5, rtol=2e-5)
    assert jnp.allclose(dc, r_dc, atol=2e-5, rtol=2e-5)

    print("KERNEL_OK")
</pallas_src>

<mosaic_0001>
module attributes {stable_mosaic.version = 11 : i64} {
  func.func @_odefunc_att_kernel(%arg0: i32, %arg1: memref<16x32xf32, #tpu.memory_space<vmem>>, %arg2: memref<32x64xf32, #tpu.memory_space<vmem>>, %arg3: memref<1x64xf32, #tpu.memory_space<vmem>>, %arg4: memref<64x32xf32, #tpu.memory_space<vmem>>, %arg5: memref<1x32xf32, #tpu.memory_space<vmem>>, %arg6: memref<32x32xf32, #tpu.memory_space<vmem>>, %arg7: memref<1x32xf32, #tpu.memory_space<vmem>>, %arg8: memref<16x8x32xf32, #tpu.memory_space<vmem>>, %arg9: memref<16x32xf32, #tpu.memory_space<vmem>>, %arg10: memref<16x8xf32, #tpu.memory_space<vmem>>, %arg11: memref<16x256xf32, #tpu.memory_space<vmem>>) attributes {dimension_semantics = [#tpu.dimension_semantics<parallel>], iteration_bounds = array<i64: 2>, scalar_prefetch = 0 : i64, scratch_operands = 0 : i64, tpu.core_type = #tpu.core_type<tc>, window_params = [{transform_indices = @transform_0, window_bounds = array<i64: 16, 32>}, {pipeline_mode = #tpu.pipeline_mode<synchronous>, transform_indices = @transform_1, window_bounds = array<i64: 32, 64>}, {pipeline_mode = #tpu.pipeline_mode<synchronous>, transform_indices = @transform_2, window_bounds = array<i64: 1, 64>}, {pipeline_mode = #tpu.pipeline_mode<synchronous>, transform_indices = @transform_3, window_bounds = array<i64: 64, 32>}, {pipeline_mode = #tpu.pipeline_mode<synchronous>, transform_indices = @transform_4, window_bounds = array<i64: 1, 32>}, {pipeline_mode = #tpu.pipeline_mode<synchronous>, transform_indices = @transform_5, window_bounds = array<i64: 32, 32>}, {pipeline_mode = #tpu.pipeline_mode<synchronous>, transform_indices = @transform_6, window_bounds = array<i64: 1, 32>}, {transform_indices = @transform_7, window_bounds = array<i64: 16, 8, 32>}, {transform_indices = @transform_8, window_bounds = array<i64: 16, 32>}, {transform_indices = @transform_9, window_bounds = array<i64: 16, 8>}, {transform_indices = @transform_10, window_bounds = array<i64: 16, 256>}]} {
    %c0 = arith.constant 0 : index
    %c0_0 = arith.constant 0 : index
    %0 = vector.load %arg1[%c0, %c0_0] : memref<16x32xf32, #tpu.memory_space<vmem>>, vector<16x32xf32>
    %c0_1 = arith.constant 0 : index
    %c0_2 = arith.constant 0 : index
    %1 = vector.load %arg2[%c0_1, %c0_2] : memref<32x64xf32, #tpu.memory_space<vmem>>, vector<32x64xf32>
    %cst = arith.constant dense<0.000000e+00> : vector<16x64xf32>
    %2 = tpu.matmul %0, %1, %cst {dimension_numbers = #tpu.dot_dimension_numbers<[1], [0], [0], [1], [0, 0, 1, 1], [], []>} : vector<16x32xf32>, vector<32x64xf32>, vector<16x64xf32> -> vector<16x64xf32>
    %c0_3 = arith.constant 0 : index
    %c0_4 = arith.constant 0 : index
    %3 = vector.load %arg3[%c0_3, %c0_4] : memref<1x64xf32, #tpu.memory_space<vmem>>, vector<1x64xf32>
    %4 = vector.broadcast %3 : vector<1x64xf32> to vector<16x64xf32>
    %5 = arith.addf %2, %4 : vector<16x64xf32>
    %6 = math.tanh %5 : vector<16x64xf32>
    %c0_5 = arith.constant 0 : index
    %c0_6 = arith.constant 0 : index
    %7 = vector.load %arg4[%c0_5, %c0_6] : memref<64x32xf32, #tpu.memory_space<vmem>>, vector<64x32xf32>
    %cst_7 = arith.constant dense<0.000000e+00> : vector<16x32xf32>
    %8 = tpu.matmul %6, %7, %cst_7 {dimension_numbers = #tpu.dot_dimension_numbers<[1], [0], [0], [1], [0, 0, 1, 1], [], []>} : vector<16x64xf32>, vector<64x32xf32>, vector<16x32xf32> -> vector<16x32xf32>
    %c0_8 = arith.constant 0 : index
    %c0_9 = arith.constant 0 : index
    %9 = vector.load %arg5[%c0_8, %c0_9] : memref<1x32xf32, #tpu.memory_space<vmem>>, vector<1x32xf32>
    %10 = vector.broadcast %9 : vector<1x32xf32> to vector<16x32xf32>
    %11 = arith.addf %8, %10 : vector<16x32xf32>
    %c0_10 = arith.constant 0 : index
    %c0_11 = arith.constant 0 : index
    %12 = vector.load %arg9[%c0_10, %c0_11] : memref<16x32xf32, #tpu.memory_space<vmem>>, vector<16x32xf32>
    tpu.vector_store %arg9[%c0_10, %c0_11], %11 {strides = array<i32>} : memref<16x32xf32, #tpu.memory_space<vmem>>, vector<16x32xf32>,
    %c0_12 = arith.constant 0 : index
    %c0_13 = arith.constant 0 : index
    %13 = vector.load %arg6[%c0_12, %c0_13] : memref<32x32xf32, #tpu.memory_space<vmem>>, vector<32x32xf32>
    %cst_14 = arith.constant dense<0.000000e+00> : vector<16x32xf32>
    %14 = tpu.matmul %0, %13, %cst_14 {dimension_numbers = #tpu.dot_dimension_numbers<[1], [1], [0], [0], [0, 0, 1, 0], [], []>} : vector<16x32xf32>, vector<32x32xf32>, vector<16x32xf32> -> vector<16x32xf32>
    %c0_15 = arith.constant 0 : index
    %c0_16 = arith.constant 0 : index
    %15 = vector.load %arg7[%c0_15, %c0_16] : memref<1x32xf32, #tpu.memory_space<vmem>>, vector<1x32xf32>
    %16 = vector.broadcast %15 : vector<1x32xf32> to vector<16x32xf32>
    %17 = arith.mulf %0, %16 : vector<16x32xf32>
    %cst_17 = arith.constant dense<0.000000e+00> : vector<16xf32>
    %18 = vector.multi_reduction <add>, %17, %cst_17 [1] : vector<16x32xf32> to vector<16xf32>
    %19 = vector.shape_cast %18 : vector<16xf32> to vector<16x1xf32>
    %c0_18 = arith.constant 0 : index
    %c0_19 = arith.constant 0 : index
    %c0_20 = arith.constant 0 : index
    %20 = vector.load %arg8[%c0_18, %c0_19, %c0_20] : memref<16x8x32xf32, #tpu.memory_space<vmem>>, vector<16x8x32xf32>
    %21 = vector.shape_cast %14 : vector<16x32xf32> to vector<16x1x32xf32>
    %22 = vector.broadcast %21 : vector<16x1x32xf32> to vector<16x8x32xf32>
    %23 = arith.mulf %20, %22 : vector<16x8x32xf32>
    %cst_21 = arith.constant dense<0.000000e+00> : vector<16x8xf32>
    %24 = vector.multi_reduction <add>, %23, %cst_21 [2] : vector<16x8x32xf32> to vector<16x8xf32>
    %25 = vector.broadcast %19 : vector<16x1xf32> to vector<16x8xf32>
    %26 = arith.addf %24, %25 : vector<16x8xf32>
    %27 = math.tanh %26 : vector<16x8xf32>
    %28 = math.exp %27 : vector<16x8xf32>
    %29 = vector.shape_cast %28 : vector<16x8xf32> to vector<16x8x1xf32>
    %30 = vector.shape_cast %0 : vector<16x32xf32> to vector<16x1x32xf32>
    %31 = vector.broadcast %29 : vector<16x8x1xf32> to vector<16x8x32xf32>
    %32 = vector.broadcast %30 : vector<16x1x32xf32> to vector<16x8x32xf32>
    %33 = arith.mulf %31, %32 : vector<16x8x32xf32>
    %34 = vector.shape_cast %33 : vector<16x8x32xf32> to vector<16x256xf32>
    %c0_22 = arith.constant 0 : index
    %c0_23 = arith.constant 0 : index
    %35 = vector.load %arg10[%c0_22, %c0_23] : memref<16x8xf32, #tpu.memory_space<vmem>>, vector<16x8xf32>
    tpu.vector_store %arg10[%c0_22, %c0_23], %28 {strides = array<i32>} : memref<16x8xf32, #tpu.memory_space<vmem>>, vector<16x8xf32>,
    %c0_24 = arith.constant 0 : index
    %c0_25 = arith.constant 0 : index
    %36 = vector.load %arg11[%c0_24, %c0_25] : memref<16x256xf32, #tpu.memory_space<vmem>>, vector<16x256xf32>
    tpu.vector_store %arg11[%c0_24, %c0_25], %34 {strides = array<i32>} : memref<16x256xf32, #tpu.memory_space<vmem>>, vector<16x256xf32>,
    return
  }
  func.func @transform_0(%arg0: i32) -> (i32, i32) {
    %c0_i32 = arith.constant 0 : i32
    %c0_i32_0 = arith.constant 0 : i32
    return %arg0, %c0_i32 : i32, i32
  }
  func.func @transform_1(%arg0: i32) -> (i32, i32) {
    %c0_i32 = arith.constant 0 : i32
    %c0_i32_0 = arith.constant 0 : i32
    %c0_i32_1 = arith.constant 0 : i32
    return %c0_i32, %c0_i32_0 : i32, i32
  }
  func.func @transform_2(%arg0: i32) -> (i32, i32) {
    %c0_i32 = arith.constant 0 : i32
    %c0_i32_0 = arith.constant 0 : i32
    %c0_i32_1 = arith.constant 0 : i32
    return %c0_i32, %c0_i32_0 : i32, i32
  }
  func.func @transform_3(%arg0: i32) -> (i32, i32) {
    %c0_i32 = arith.constant 0 : i32
    %c0_i32_0 = arith.constant 0 : i32
    %c0_i32_1 = arith.constant 0 : i32
    return %c0_i32, %c0_i32_0 : i32, i32
  }
  func.func @transform_4(%arg0: i32) -> (i32, i32) {
    %c0_i32 = arith.constant 0 : i32
    %c0_i32_0 = arith.constant 0 : i32
    %c0_i32_1 = arith.constant 0 : i32
    return %c0_i32, %c0_i32_0 : i32, i32
  }
  func.func @transform_5(%arg0: i32) -> (i32, i32) {
    %c0_i32 = arith.constant 0 : i32
    %c0_i32_0 = arith.constant 0 : i32
    %c0_i32_1 = arith.constant 0 : i32
    return %c0_i32, %c0_i32_0 : i32, i32
  }
  func.func @transform_6(%arg0: i32) -> (i32, i32) {
    %c0_i32 = arith.constant 0 : i32
    %c0_i32_0 = arith.constant 0 : i32
    %c0_i32_1 = arith.constant 0 : i32
    return %c0_i32, %c0_i32_0 : i32, i32
  }
  func.func @transform_7(%arg0: i32) -> (i32, i32, i32) {
    %c0_i32 = arith.constant 0 : i32
    %c0_i32_0 = arith.constant 0 : i32
    %c0_i32_1 = arith.constant 0 : i32
    return %arg0, %c0_i32, %c0_i32_0 : i32, i32, i32
  }
  func.func @transform_8(%arg0: i32) -> (i32, i32) {
    %c0_i32 = arith.constant 0 : i32
    %c0_i32_0 = arith.constant 0 : i32
    return %arg0, %c0_i32 : i32, i32
  }
  func.func @transform_9(%arg0: i32) -> (i32, i32) {
    %c0_i32 = arith.constant 0 : i32
    %c0_i32_0 = arith.constant 0 : i32
    return %arg0, %c0_i32 : i32, i32
  }
  func.func @transform_10(%arg0: i32) -> (i32, i32) {
    %c0_i32 = arith.constant 0 : i32
    %c0_i32_0 = arith.constant 0 : i32
    return %arg0, %c0_i32 : i32, i32
  }
}

</mosaic_0001>

<bundles_post_ra>
// kernel: odefunc_att_forward.1
= control target key start
LH: loop header
LB: loop body
LE: loop exit
PB: predicated region body
PF: predicated region fallthrough
CT: control target
= control target key end

     0   :  { %s2249_s13 = smov 0   ;;  %s2708_s0 = inlined_call_operand.vmem [shape: f32[32,32], index: 0, kind: input, shape index: {}]   ;;  %s2709_s1 = inlined_call_operand.vmem [shape: f32[32,64], index: 1, kind: input, shape index: {}]   ;;  %s2710_s2 = inlined_call_operand.vmem [shape: f32[1,64], index: 2, kind: input, shape index: {}]   ;;  %s2711_s3 = inlined_call_operand.vmem [shape: f32[64,32], index: 3, kind: input, shape index: {}]   ;;  %s2712_s4 = inlined_call_operand.vmem [shape: f32[1,32], index: 4, kind: input, shape index: {}]   ;;  %s2713_s5 = inlined_call_operand.vmem [shape: f32[32,32], index: 5, kind: input, shape index: {}]   ;;  %s2714_s6 = inlined_call_operand.vmem [shape: f32[1,32], index: 6, kind: input, shape index: {}]   ;;  %s2715_s7 = inlined_call_operand.vmem [shape: f32[32,8,32], index: 7, kind: input, shape index: {}]   ;;  %s2716_s8 = inlined_call_operand.vmem [shape: f32[32,32], index: 8, kind: output, shape index: {0}]   ;;  %s2717_s9 = inlined_call_operand.vmem [shape: f32[32,8], index: 9, kind: output, shape index: {1}]   ;;  %s2718_s10 = inlined_call_operand.vmem [shape: f32[32,256], index: 10, kind: output, shape index: {2}]  }
   0x1 LB: > { %s1963_s14 = sadd.s32 4294967295, %s2185_s13   ;;  %p1967_p0 = scmp.ge.s32.totalorder %s2185_s13, 1  ;;  %s2185_s13 = sphi %s2249_s13, %s21_s13  }
   0x2   : > { %p329_p1 = scmp.lt.s32.totalorder %s2185_s13, 3 }
   0x4   : > { %p330_p2 = pnand %p1967_p0, %p329_p1 }
   0x5   : > { %v416_v0 = vld [vmem:[%s2709_s1] sm:$0xff] (!%p330_p2)  ;;  %v417_v1 = vld [vmem:[%s2709_s1 + $0x8] sm:$0xff] (!%p330_p2)  ;;  %v418_v2 = vld [vmem:[%s2709_s1 + $0x10] sm:$0xff] (!%p330_p2)  ;;  %s1968_s21 = sshll.u32 (!%p330_p2), %s1963_s14, 1  ;;  %vm427_vm0 = vcmask (!%p330_p2), 261120   ;;  %v738_v38 = vlaneseq (!%p330_p2)  ;;  %s1970_s23 = sshll.u32 (!%p330_p2), %s1963_s14, 4 }
   0x6   : > { %333 = sbr.rel (%p330_p2) target bundleno = 743 (0x2e7), region = 52  ;;  %v2058_v3 = vpack.c.bf16 (!%p330_p2), %v417_v1, %v416_v0  ;;  %v419_v4 = vld [vmem:[%s2709_s1 + $0x18] sm:$0xff] (!%p330_p2)  ;;  %p384_p3 = scmp.lt.s32.totalorder (!%p330_p2), %s1968_s21, 3  ;;  %v610_v6 = vld [vmem:[%s2713_s5] sm:$0xff] (!%p330_p2)  ;;  %v611_v7 = vld [vmem:[%s2713_s5 + $0x8] sm:$0xff] (!%p330_p2)  ;;  %vm526_vm2 = vcmask (!%p330_p2), 523264  }
   0x7   : > { %v2062_v5 = vpack.c.bf16 (!%p330_p2), %v419_v4, %v418_v2  ;;  %v2082_v8 = vpack.c.bf16 (!%p330_p2), %v611_v7, %v610_v6  ;;  %vm2083_vm1 = vmpackc.low (!%p330_p2), %vm427_vm0, %vm427_vm0  ;;  %v612_v11 = vld [vmem:[%s2713_s5 + $0x10] sm:$0xff] (!%p330_p2)  ;;  %v613_v12 = vld [vmem:[%s2713_s5 + $0x18] sm:$0xff] (!%p330_p2)  ;;  %v2187_v36 = vmov (!%p330_p2), 1966171168   ;;  %p390_p4 = scmp.lt.s32.totalorder (!%p330_p2), %s1970_s23, 31  ;;  %v2343_v42 = vshrl.u32 (!%p330_p2), %v738_v38, 7 }
   0x8   : > { %2059 = vmatprep.subr.bf16.mxu0 (!%p330_p2), %v2058_v3  ;;  %v2088_v13 = vpack.c.bf16 (!%p330_p2), %v613_v12, %v612_v11  ;;  %v511_v14 = vld [vmem:[%s2711_s3] sm:$0xff] (!%p330_p2)  ;;  %v512_v15 = vld [vmem:[%s2711_s3 + $0x8] sm:$0xff] (!%p330_p2)  ;;  %v513_v17 = vld [vmem:[%s2711_s3 + $0x10] sm:$0xff] (!%p330_p2)  ;;  %v736_v37 = vunpack.c.l.s4 (!%p330_p2), %v2187_v36  ;;  %vm1795_vm3 = vcmask (!%p330_p2), 1041409   ;;  %vm1797_vm4 = vcmask (!%p330_p2), 1042434   ;;  %s2192_s18 = smov (!%p330_p2), 64  }
   0x9   : > { %2061 = vmatpush3.bf16.msra.mxu0 (!%p330_p2), %v2058_v3  ;;  %v2066_v16 = vpack.c.bf16 (!%p330_p2), %v512_v15, %v511_v14  ;;  %v514_v18 = vld [vmem:[%s2711_s3 + $0x18] sm:$0xff] (!%p330_p2)  ;;  %v515_v20 = vld [vmem:[%s2711_s3 + $0x20] sm:$0xff] (!%p330_p2)  ;;  %v516_v21 = vld [vmem:[%s2711_s3 + $0x28] sm:$0xff] (!%p330_p2)  ;;  %v2355_v52 = vsub.s32 (!%p330_p2), 0, %v2343_v42  ;;  %vm1799_vm5 = vcmask (!%p330_p2), 1043459   ;;  %vm1801_vm6 = vcmask (!%p330_p2), 1044484  }
   0xa   : > { %2063 = vmatprep.subr.bf16.mxu0 (!%p330_p2), %v2062_v5  ;;  %v2070_v19 = vpack.c.bf16 (!%p330_p2), %v514_v18, %v513_v17  ;;  %v2074_v22 = vpack.c.bf16 (!%p330_p2), %v516_v21, %v515_v20  ;;  %v517_v23 = vld [vmem:[%s2711_s3 + $0x30] sm:$0xff] (!%p330_p2)  ;;  %v518_v24 = vld [vmem:[%s2711_s3 + $0x38] sm:$0xff] (!%p330_p2)  ;;  %v1991_v26 = vld [vmem:[%s2714_s6] ss:$0 sm:$0xff] (!%p330_p2)  ;;  %v737_v41 = vunpack.c.0.s8 (!%p330_p2), %v736_v37  ;;  %vm1803_vm7 = vcmask (!%p330_p2), 1045509   ;;  %s2193_s19 = smov (!%p330_p2), 96  }
   0xb   : > { %2067 = vmatprep.subr.bf16.mxu1 (!%p330_p2), %v2066_v16  ;;  %v2078_v25 = vpack.c.bf16 (!%p330_p2), %v518_v24, %v517_v23  ;;  %v1979_v31 = vld [vmem:[%s2710_s2] ss:$0 sm:$0xff] (!%p330_p2)  ;;  %vm1805_vm8 = vcmask (!%p330_p2), 1046534   ;;  %vm1807_vm9 = vcmask (!%p330_p2), 1047559   ;;  %vm1818_vm10 = vcmask (!%p330_p2), 64512  }
   0xc   : > { %2069 = vmatpush3.bf16.msra.mxu1 (!%p330_p2), %v2066_v16  ;;  %v2348_v43 = vsub.s32 (!%p330_p2), %v737_v41, %v2343_v42  ;;  %vm1720_vm11 = vcmask (!%p330_p2), 785408  }
   0xd   : > { %s2720_s21 = smov (!%p384_p3, %s1968_s21), 3  ;;  %2065 = vmatpush3.bf16.msra.mxu0 %v2062_v5  ;;  %2071 = vmatprep.subr.bf16.mxu1 %v2070_v19  ;;  %s2722_s23 = smov (!%p390_p4, %s1970_s23), 31 }
   0xe   : > { %s2280_s28 = sshll.u32 %s2720_s21, 3  ;;  %2084 = vmatprep.subr.msk.bf16.mxu0 %vm2083_vm1, %v2082_v8  ;;  %s1971_s24 = sshll.u32 %s2722_s23, 3 }
   0xf   : > { %s387_s11 = scalar_lea.vmem %s2708_s0, %s2280_s28  ;;  %s2360_s26 = scalar_lea.vmem %s2715_s7, %s1971_s24 }
  0x10   : > { %v2288_v9 = vld [vmem:[%s387_s11] sm:$0xff]  ;;  %v2292_v10 = vld [vmem:[%s387_s11 + $0x8] sm:$0xff]  ;;  %2073 = vmatpush3.bf16.msra.mxu1 %v2070_v19  ;;  %v726_v2 = vld [vmem:[%s2360_s26 + $0x50] sm:$0xff]  ;;  %s399_s12 = scalar_lea.vmem %s2716_s8, %s2280_s28  ;;  %s2607_s17 = scalar_lea.vmem %s2717_s9, %s2280_s28 }
  0x11   : > { %2025 = vmatprep.mubr.msk.f32.mxu0 %vm427_vm0, %v2288_v9  ;;  %2075 = vmatprep.subr.bf16.mxu1 %v2074_v22  ;;  %v708_v27 = vmul.f32 %v1991_v26, %v2288_v9  ;;  %v709_v29 = vmul.f32 %v1991_v26, %v2292_v10  ;;  %v724_v60 = vld [vmem:[%s2360_s26 + $0x40] sm:$0xff]  ;;  %v725_v3 = vld [vmem:[%s2360_s26 + $0x48] sm:$0xff]  ;;  %s2191_s28 = smov 32   ;;  %s1994_s20 = sshll.u32 %s2720_s21, 4 }
  0x12   : > { %2026 = vmatmul.mubr.msk.f32.vlgmr.msra.gmra.mrb[0].mxu0 %vm427_vm0, %v2292_v10  ;;  %v716_v61 = vld [vmem:[%s2360_s26] sm:$0xff]  ;;  %v717_v19 = vld [vmem:[%s2360_s26 + $0x8] sm:$0xff]  ;;  %s412_s24 = scalar_lea.vmem %s2718_s10, %s1994_s20 }
  0x13   : > { %2055 = vmatprep.mubr.msk.f32.mxu0 %vm427_vm0, %v2288_v9  ;;  %v710_v28 = vsel %vm427_vm0, %v708_v27, 0.0  ;;  %v713_v30 = vsel %vm427_vm0, %v709_v29, 0.0  ;;  %v728_v18 = vld [vmem:[%s2360_s26 + $0x60] sm:$0xff]  ;;  %v718_v27 = vld [vmem:[%s2360_s26 + $0x10] sm:$0xff]  ;;  %v729_v41 = vld [vmem:[%s2360_s26 + $0x68] sm:$0xff] }
  0x14   : > { %2077 = vmatpush3.bf16.msra.mxu1 %v2074_v22  ;;  %711 = vadd.xlane.f32.xlu0 %v710_v28  ;;  %v727_v28 = vld [vmem:[%s2360_s26 + $0x58] sm:$0xff] }
  0x15   : > { %2079 = vmatprep.subr.bf16.mxu1 %v2078_v25 }
  0x16   : > { %2087 = vmatpush3.bf16.xpose.msk.msra.mxu0 %vm2083_vm1, %v2082_v8 }
  0x17   : > { %2090 = vmatprep.subr.msk.bf16.mxu0 %vm2083_vm1, %v2088_v13 }
  0x18   : > { %2081 = vmatpush3.bf16.msra.mxu1 %v2078_v25  ;;  %714 = vadd.xlane.f32.xlu0 %v713_v30 }
  0x1e   : > { %2093 = vmatpush3.bf16.xpose.msk.msra.mxu0 %vm2083_vm1, %v2088_v13 }
  0x25   : > { %2056 = vmatmul.mubr.msk.f32.vlgmr.msra.gmra.mrb[2].mxu0 %vm427_vm0, %v2292_v10 }
  0xe5   : > { %v2027_v32 = vpop.f32.mrb[0].mxu0 }
  0xe6   : > { %v506_v33 = vadd.f32 %v2027_v32, %v1979_v31  ;;  %v500_v34 = vpop.f32.mrb[1].mxu0 }
  0xe7   : > { %v501_v35 = vadd.f32 %v1979_v31, %v500_v34 }
  0xe8   : > { %2111 = vtanh.f32 %v506_v33 }
  0xe9   : > { %2113 = vtanh.f32 %v501_v35 }
  0xf2   : > { %v2112_v39 = vpop.eup %2111 }
  0xf3   : > { %v2114_v40 = vpop.eup %2113 }
  0xf4   : > { %2044 = vmatprep.mubr.msk.f32.mxu1 %vm526_vm2, %v2114_v40  ;;  %v720_v40 = vld [vmem:[%s2360_s26 + $0x20] sm:$0xff] }
  0xf5   : > { %2045 = vmatmul.mubr.msk.f32.vlgmr.msra.gmra.mrb[0].mxu1 %vm526_vm2, %v2112_v39 }
  0xf8   : > { %v2057_v44 = vpop.f32.mrb[2].mxu0 }
  0xf9   : > { %v783_v45 = vcombine.high %v2057_v44, %v2057_v44  ;;  %v790_v46 = vrot.slane %v2057_v44, %v2348_v43  ;;  %v692_v47 = vpop.f32.mrb[3].mxu0 }
  0xfa   : > { %v741_v48 = vrot.slane %v692_v47, %v2348_v43  ;;  %v734_v57 = vcombine.high %v692_v47, %v692_v47 }
  0xfb   : > { %v797_v49 = vrot.slane %v783_v45, %v2348_v43  ;;  %v798_v50 = vcombine.high %v790_v46, %v790_v46  ;;  %v806_v51 = vrot.slane %v790_v46, %v2348_v43 }
  0xfc   : > { %v749_v53 = vcombine.high %v741_v48, %v741_v48  ;;  %v757_v54 = vrot.slane %v741_v48, %v2348_v43  ;;  %v748_v5 = vrot.slane %v734_v57, %v2348_v43 }
  0xfd   : > { %v820_v55 = vrot.slane %v798_v50, %v2348_v43  ;;  %v828_v56 = vcombine.high %v806_v51, %v806_v51  ;;  %v2365_v58 = vrot.slane %v797_v49, %v2348_v43  ;;  %v867_v62 = vrot.slane %v806_v51, %v2355_v52 }
  0xfe   : > { %v771_v59 = vrot.slane %v749_v53, %v2348_v43  ;;  %v835_v63 = vrot.slane %v757_v54, %v2355_v52  ;;  %v799_v4 = vcombine.high %v797_v49, %v797_v49  ;;  %v779_v8 = vcombine.high %v757_v54, %v757_v54  ;;  %v722_v53 = vld [vmem:[%s2360_s26 + $0x30] sm:$0xff]  ;;  %v719_v54 = vld [vmem:[%s2360_s26 + $0x18] sm:$0xff] }
  0xff   : > { %v875_v0 = vrot.slane %v828_v56, %v2355_v52  ;;  %v871_v1 = vrot.slane %v820_v55, %v2355_v52  ;;  %v920_v6 = vmul.f32 %v867_v62, %v724_v60  ;;  %v883_v11 = vrot.slane %v2365_v58, %v2355_v52  ;;  %v730_v62 = vld [vmem:[%s2360_s26 + $0x70] sm:$0xff] }
 0x100   : > { %v912_v7 = vmul.f32 %v835_v63, %v716_v61  ;;  %v839_v12 = vrot.slane %v771_v59, %v2355_v52  ;;  %v830_v13 = vcombine.high %v820_v55, %v820_v55  ;;  %v843_v22 = vrot.slane %v779_v8, %v2355_v52  ;;  %v721_v63 = vld [vmem:[%s2360_s26 + $0x28] sm:$0xff] }
 0x101   : > { %v952_v14 = vsel %vm427_vm0, %v920_v6, 0.0  ;;  %v922_v16 = vmul.f32 %v875_v0, %v726_v2  ;;  %v921_v17 = vmul.f32 %v871_v1, %v725_v3  ;;  %v924_v20 = vmul.f32 %v883_v11, %v728_v18  ;;  %v723_v6 = vld [vmem:[%s2360_s26 + $0x38] sm:$0xff]  ;;  %v2423_v18 = vpop.xlane.xlu0 %711 }
 0x102   : > { %v928_v15 = vsel %vm427_vm0, %v912_v7, 0.0  ;;  %953 = vadd.xlane.f32.xlu0 %v952_v14  ;;  %v913_v21 = vmul.f32 %v839_v12, %v717_v19  ;;  %v879_v23 = vrot.slane %v830_v13, %v2355_v52  ;;  %v764_v24 = vrot.slane %v748_v5, %v2348_v43  ;;  %v731_v13 = vld [vmem:[%s2360_s26 + $0x78] sm:$0xff] }
 0x103   : > { %929 = vadd.xlane.f32.xlu1 %v928_v15  ;;  %v958_v25 = vsel %vm427_vm0, %v922_v16, 0.0  ;;  %v955_v26 = vsel %vm427_vm0, %v921_v17, 0.0  ;;  %v827_v29 = vrot.slane %v799_v4, %v2348_v43  ;;  %v750_v30 = vcombine.high %v748_v5, %v748_v5 }
 0x104   : > { %v964_v31 = vsel %vm427_vm0, %v924_v20, 0.0  ;;  %v931_v32 = vsel %vm427_vm0, %v913_v21, 0.0  ;;  %v914_v33 = vmul.f32 %v843_v22, %v718_v27  ;;  %v923_v34 = vmul.f32 %v879_v23, %v727_v28 }
 0x105   : > { %v851_v35 = vrot.slane %v764_v24, %v2355_v52  ;;  %v887_v36 = vrot.slane %v827_v29, %v2355_v52  ;;  %v780_v37 = vcombine.high %v764_v24, %v764_v24  ;;  %v781_v39 = vcombine.high %v771_v59, %v771_v59  ;;  %v2425_v19 = vpop.xlane.xlu0 %714 }
 0x106   : > { %959 = vadd.xlane.f32.xlu0 %v958_v25  ;;  %v934_v44 = vsel %vm427_vm0, %v914_v33, 0.0  ;;  %v961_v45 = vsel %vm427_vm0, %v923_v34, 0.0  ;;  %v829_v46 = vcombine.high %v2365_v58, %v2365_v58  ;;  %v778_v47 = vrot.slane %v750_v30, %v2348_v43 }
 0x107   : > { %956 = vadd.xlane.f32.xlu1 %v955_v26  ;;  %v916_v48 = vmul.f32 %v851_v35, %v720_v40  ;;  %v925_v49 = vmul.f32 %v887_v36, %v729_v41  ;;  %v859_v50 = vrot.slane %v780_v37, %v2355_v52  ;;  %v847_v51 = vrot.slane %v781_v39, %v2355_v52 }
 0x108   : > { %v891_v55 = vrot.slane %v829_v46, %v2355_v52  ;;  %v855_v56 = vrot.slane %v778_v47, %v2355_v52  ;;  %v782_v57 = vcombine.high %v778_v47, %v778_v47  ;;  %v831_v5 = vcombine.high %v827_v29, %v827_v29 }
 0x109   : > { %v940_v58 = vsel %vm427_vm0, %v916_v48, 0.0  ;;  %v967_v59 = vsel %vm427_vm0, %v925_v49, 0.0  ;;  %v918_v60 = vmul.f32 %v859_v50, %v722_v53  ;;  %v915_v61 = vmul.f32 %v847_v51, %v719_v54 }
 0x10a   : > { %965 = vadd.xlane.f32.xlu0 %v964_v31  ;;  %v926_v0 = vmul.f32 %v891_v55, %v730_v62  ;;  %v917_v1 = vmul.f32 %v855_v56, %v721_v63  ;;  %v863_v4 = vrot.slane %v782_v57, %v2355_v52  ;;  %v895_v12 = vrot.slane %v831_v5, %v2355_v52 }
 0x10b   : > { %932 = vadd.xlane.f32.xlu1 %v931_v32  ;;  %v946_v2 = vsel %vm427_vm0, %v918_v60, 0.0  ;;  %v937_v3 = vsel %vm427_vm0, %v915_v61, 0.0  ;;  %v2188_v17 = vmov 0   ;;  %v1013_v20 = vrot.slane %v2425_v19, %v2355_v52 }
 0x10c   : > { %v970_v7 = vsel %vm427_vm0, %v926_v0, 0.0  ;;  %v943_v8 = vsel %vm427_vm0, %v917_v1, 0.0  ;;  %v919_v11 = vmul.f32 %v863_v4, %v723_v6  ;;  %v927_v15 = vmul.f32 %v895_v12, %v731_v13  ;;  %2109 = vset.pattern.permute.xlu1 %v2188_v17  ;;  %2110 = vset.pattern.permute.xlu0 %v2188_v17 }
 0x10d   : > { %v981_v21 = vrot.slane %v2423_v18, %v2355_v52  ;;  %v988_v26 = vsub.s32 2, %v2343_v42  ;;  %v984_v27 = vsub.s32 1, %v2343_v42  ;;  %v996_v34 = vsub.s32 4, %v2343_v42 }
 0x10e   : > { %935 = vadd.xlane.f32.xlu0 %v934_v44  ;;  %v949_v14 = vsel %vm427_vm0, %v919_v11, 0.0  ;;  %v973_v16 = vsel %vm427_vm0, %v927_v15, 0.0  ;;  %v992_v44 = vsub.s32 3, %v2343_v42  ;;  %v1000_v55 = vsub.s32 5, %v2343_v42 }
 0x10f   : > { %962 = vadd.xlane.f32.xlu1 %v961_v45  ;;  %v1021_v28 = vrot.slane %v2425_v19, %v988_v26  ;;  %v1017_v29 = vrot.slane %v2425_v19, %v984_v27  ;;  %v1029_v35 = vrot.slane %v2425_v19, %v996_v34  ;;  %v985_v36 = vrot.slane %v2423_v18, %v984_v27 }
 0x110   : > { %v989_v45 = vrot.slane %v2423_v18, %v988_v26  ;;  %v1025_v47 = vrot.slane %v2425_v19, %v992_v44  ;;  %v997_v57 = vrot.slane %v2423_v18, %v996_v34  ;;  %v993_v4 = vrot.slane %v2423_v18, %v992_v44 }
 0x111   : > { %v1001_v13 = vrot.slane %v2423_v18, %v1000_v55  ;;  %v1008_v17 = vsub.s32 7, %v2343_v42 }
 0x112   : > { %941 = vadd.xlane.f32.xlu0 %v940_v58 }
 0x113   : > { %968 = vadd.xlane.f32.xlu1 %v967_v59  ;;  %v1033_v59 = vrot.slane %v2425_v19, %v1000_v55  ;;  %v1009_v27 = vrot.slane %v2423_v18, %v1008_v17  ;;  %v1041_v34 = vrot.slane %v2425_v19, %v1008_v17  ;;  %v1129_v17 = vrot.slane %v2288_v9, %v2348_v43 }
 0x116   : > { %947 = vadd.xlane.f32.xlu0 %v946_v2 }
 0x117   : > { %938 = vadd.xlane.f32.xlu1 %v937_v3  ;;  %v1004_v3 = vsub.s32 6, %v2343_v42 }
 0x119   : > { %v1005_v15 = vrot.slane %v2423_v18, %v1004_v3  ;;  %v1037_v18 = vrot.slane %v2425_v19, %v1004_v3 }
 0x11a   : > { %971 = vadd.xlane.f32.xlu0 %v970_v7 }
 0x11b   : > { %944 = vadd.xlane.f32.xlu1 %v943_v8 }
 0x11f   : > { %950 = vadd.xlane.f32.xlu1 %v949_v14 }
 0x123   : > { %974 = vadd.xlane.f32.xlu1 %v973_v16 }
 0x18f   : > { %v954_v22 = vpop.xlane.xlu0 %953 }
 0x190   : > { %v930_v23 = vpop.xlane.xlu1 %929  ;;  %v1066_v24 = vadd.f32 %v1013_v20, %v954_v22 }
 0x191   : > { %v1058_v25 = vadd.f32 %v981_v21, %v930_v23 }
 0x192   : > { %2115 = vtanh.f32 %v1066_v24 }
 0x193   : > { %2117 = vtanh.f32 %v1058_v25  ;;  %v960_v30 = vpop.xlane.xlu0 %959 }
 0x194   : > { %v957_v31 = vpop.xlane.xlu1 %956  ;;  %v1068_v32 = vadd.f32 %v1021_v28, %v960_v30 }
 0x195   : > { %v1067_v33 = vadd.f32 %v1017_v29, %v957_v31 }
 0x196   : > { %2119 = vtanh.f32 %v1068_v32 }
 0x197   : > { %2121 = vtanh.f32 %v1067_v33  ;;  %v966_v37 = vpop.xlane.xlu0 %965 }
 0x198   : > { %v933_v39 = vpop.xlane.xlu1 %932  ;;  %v1070_v40 = vadd.f32 %v1029_v35, %v966_v37 }
 0x199   : > { %v1059_v41 = vadd.f32 %v985_v36, %v933_v39 }
 0x19a   : > { %2123 = vtanh.f32 %v1070_v40 }
 0x19b   : > { %2125 = vtanh.f32 %v1059_v41  ;;  %v936_v46 = vpop.xlane.xlu0 %935 }
 0x19c   : > { %v963_v48 = vpop.xlane.xlu1 %962  ;;  %v2116_v49 = vpop.eup %2115  ;;  %v1060_v50 = vadd.f32 %v989_v45, %v936_v46 }
 0x19d   : > { %v2118_v51 = vpop.eup %2117  ;;  %v1106_v53 = vmul.f32 1.442695, %v2116_v49  ;;  %v1069_v54 = vadd.f32 %v1025_v47, %v963_v48 }
 0x19e   : > { %v1090_v56 = vmul.f32 1.442695, %v2118_v51  ;;  %2127 = vtanh.f32 %v1060_v50 }
 0x19f   : > { %2129 = vpow2.f32 %v1106_v53  ;;  %v942_v58 = vpop.xlane.xlu0 %941 }
 0x1a0   : > { %v969_v60 = vpop.xlane.xlu1 %968  ;;  %v2120_v61 = vpop.eup %2119  ;;  %2131 = vpow2.f32 %v1090_v56  ;;  %v1062_v62 = vadd.f32 %v997_v57, %v942_v58 }
 0x1a1   : > { %v2122_v63 = vpop.eup %2121  ;;  %v1110_v0 = vmul.f32 1.442695, %v2120_v61  ;;  %2133 = vtanh.f32 %v1069_v54  ;;  %v1071_v1 = vadd.f32 %v1033_v59, %v969_v60 }
 0x1a2   : > { %v1108_v2 = vmul.f32 1.442695, %v2122_v63  ;;  %2135 = vtanh.f32 %v1062_v62  ;;  %v1982_v63 = vld [vmem:[%s2712_s4] ss:$0 sm:$0xff] }
 0x1a3   : > { %2137 = vpow2.f32 %v1110_v0  ;;  %v948_v12 = vpop.xlane.xlu0 %947 }
 0x1a4   : > { %v939_v5 = vpop.xlane.xlu1 %938  ;;  %v2124_v6 = vpop.eup %2123  ;;  %2139 = vpow2.f32 %v1108_v2  ;;  %v1064_v23 = vadd.f32 %v1005_v15, %v948_v12  ;;  %v1171_v15 = vcombine.high %v2292_v10, %v2292_v10 }
 0x1a5   : > { %v2126_v7 = vpop.eup %2125  ;;  %v1114_v8 = vmul.f32 1.442695, %v2124_v6  ;;  %2141 = vtanh.f32 %v1071_v1  ;;  %v1061_v11 = vadd.f32 %v993_v4, %v939_v5 }
 0x1a6   : > { %v1092_v14 = vmul.f32 1.442695, %v2126_v7 }
 0x1a7   : > { %2143 = vpow2.f32 %v1114_v8  ;;  %v972_v37 = vpop.xlane.xlu0 %971 }
 0x1a8   : > { %v945_v16 = vpop.xlane.xlu1 %944  ;;  %v2128_v20 = vpop.eup %2127  ;;  %2145 = vtanh.f32 %v1061_v11  ;;  %v1072_v45 = vadd.f32 %v1037_v18, %v972_v37 }
 0x1a9   : > { %v1063_v21 = vadd.f32 %v1001_v13, %v945_v16  ;;  %v2130_v22 = vpop.eup %2129  ;;  %2147 = vpow2.f32 %v1092_v14  ;;  %v1094_v26 = vmul.f32 1.442695, %v2128_v20  ;;  %v1178_v14 = vrot.slane %v2292_v10, %v2348_v43 }
 0x1aa   : > { %v2132_v24 = vpop.eup %2131  ;;  %1262 = vperm.xlu1 %2109, %v2130_v22   ;;  %v2189_v20 = vmov 1983009808   ;;  %v1122_v22 = vcombine.high %v2288_v9, %v2288_v9 }
 0x1ab   : > { %v2134_v25 = vpop.eup %2133  ;;  %1222 = vperm.xlu0 %2110, %v2132_v24   ;;  %2149 = vtanh.f32 %v1063_v21  ;;  %v1399_v21 = vunpack.c.l.s4 %v2189_v20  ;;  %v1186_v24 = vcombine.high %v1178_v14, %v1178_v14 }
 0x1ac   : > { %v951_v28 = vpop.xlane.xlu1 %950  ;;  %v2136_v29 = vpop.eup %2135  ;;  %v1112_v30 = vmul.f32 1.442695, %v2134_v25  ;;  %2151 = vtanh.f32 %v1064_v23  ;;  %v1194_v23 = vrot.slane %v1178_v14, %v2348_v43  ;;  %v1730_v25 = vand.u32 127, %v738_v38 }
 0x1ad   : > { %v2138_v31 = vpop.eup %2137  ;;  %v1065_v32 = vadd.f32 %v1009_v27, %v951_v28  ;;  %v1098_v36 = vmul.f32 1.442695, %v2136_v29  ;;  %v1185_v27 = vrot.slane %v1171_v15, %v2348_v43  ;;  %v1137_v28 = vcombine.high %v1129_v17, %v1129_v17 }
 0x1ae   : > { %v2140_v33 = vpop.eup %2139  ;;  %2153 = vpow2.f32 %v1112_v30  ;;  %1272 = vperm.xlu1 %2109, %v2138_v31   ;;  %v1145_v29 = vrot.slane %v1129_v17, %v2348_v43  ;;  %v1400_v31 = vunpack.c.0.s8 %v1399_v21  ;;  %v1208_v9 = vrot.slane %v1186_v24, %v2348_v43 }
 0x1af   : > { %v2142_v35 = vpop.eup %2141  ;;  %2155 = vpow2.f32 %v1094_v26  ;;  %1267 = vperm.xlu0 %2110, %v2140_v33   ;;  %v1216_v26 = vcombine.high %v1194_v23, %v1194_v23  ;;  %v1187_v33 = vcombine.high %v1185_v27, %v1185_v27  ;;  %v2489_v38 = vrot.slane %v1185_v27, %v2348_v43 }
 0x1b0   : > { %v975_v39 = vpop.xlane.xlu1 %974  ;;  %v1116_v40 = vmul.f32 1.442695, %v2142_v35  ;;  %2157 = vtanh.f32 %v1065_v32  ;;  %v1136_v32 = vrot.slane %v1122_v22, %v2348_v43  ;;  %v2486_v35 = vsub.s32 %v1730_v25, %v2343_v42 }
 0x1b1   : > { %v1073_v41 = vadd.f32 %v1041_v34, %v975_v39  ;;  %v2144_v44 = vpop.eup %2143  ;;  %v2190_v39 = vmov 1934713408   ;;  %v1335_v18 = vrot.slane %v1194_v23, %v2355_v52 }
 0x1b2   : > { %2159 = vpow2.f32 %v1116_v40  ;;  %1282 = vperm.xlu1 %2109, %v2144_v44   ;;  %v2146_v46 = vpop.eup %2145  ;;  %v1138_v34 = vcombine.high %v1136_v32, %v1136_v32  ;;  %v1463_v40 = vunpack.c.l.s4 %v2190_v39  ;;  %v1343_v44 = vrot.slane %v1216_v26, %v2355_v52 }
 0x1b3   : > { %2161 = vpow2.f32 %v1098_v36  ;;  %v1096_v47 = vmul.f32 1.442695, %v2146_v46  ;;  %v2148_v48 = vpop.eup %2147  ;;  %v2492_v36 = vrot.slane %v1137_v28, %v2348_v43  ;;  %v1339_v46 = vrot.slane %v1208_v9, %v2355_v52 }
 0x1b4   : > { %2163 = vtanh.f32 %v1073_v41  ;;  %v1303_v41 = vrot.slane %v1145_v29, %v2355_v52 }
 0x1b5   : > { %v2150_v49 = vpop.eup %2149  ;;  %2165 = vtanh.f32 %v1072_v45  ;;  %v2500_v45 = vsub.s32 %v1400_v31, %v2343_v42 }
 0x1b6   : > { %1227 = vperm.xlu1 %2109, %v2148_v48   ;;  %v2152_v50 = vpop.eup %2151  ;;  %2167 = vpow2.f32 %v1096_v47  ;;  %v1100_v51 = vmul.f32 1.442695, %v2150_v49  ;;  %v1218_v47 = vcombine.high %v1208_v9, %v1208_v9  ;;  %v1167_v48 = vcombine.high %v1145_v29, %v1145_v29 }
 0x1b7   : > { %v1102_v55 = vmul.f32 1.442695, %v2152_v50  ;;  %v2504_v50 = vrot.slane %v1187_v33, %v2348_v43 }
 0x1b8   : > { %v2154_v53 = vpop.eup %2153  ;;  %2169 = vpow2.f32 %v1100_v51  ;;  %v2507_v51 = vrot.slane %v1136_v32, %v2348_v43 }
 0x1b9   : > { %v2156_v54 = vpop.eup %2155  ;;  %1277 = vperm.xlu0 %2110, %v2154_v53   ;;  %2171 = vpow2.f32 %v1102_v55  ;;  %v1169_v53 = vcombine.high %v2492_v36, %v2492_v36  ;;  %v1307_v55 = vrot.slane %v2492_v36, %v2355_v52 }
 0x1ba   : > { %1232 = vperm.xlu1 %2109, %v2156_v54   ;;  %v2158_v19 = vpop.eup %2157  ;;  %v2512_v54 = vrot.slane %v1138_v34, %v2348_v43 }
 0x1bb   : > { %v1104_v59 = vmul.f32 1.442695, %v2158_v19  ;;  %v1351_v19 = vrot.slane %v2489_v38, %v2355_v52 }
 0x1bc   : > { %v2160_v56 = vpop.eup %2159  ;;  %v1170_v43 = vcombine.high %v2512_v54, %v2512_v54 }
 0x1bd   : > { %v2162_v57 = vpop.eup %2161  ;;  %1287 = vperm.xlu0 %2110, %v2160_v56  }
 0x1be   : > { %v2164_v58 = vpop.eup %2163  ;;  %1242 = vperm.xlu1 %2109, %v2162_v57   ;;  %v1464_v57 = vunpack.c.0.s8 %v1463_v40  ;;  %v1331_v17 = vrot.slane %v1170_v43, %v2355_v52 }
 0x1bf   : > { %v1120_v60 = vmul.f32 1.442695, %v2164_v58  ;;  %v2166_v61 = vpop.eup %2165  ;;  %v1168_v58 = vcombine.high %v2507_v51, %v2507_v51 }
 0x1c0   : > { %v2168_v62 = vpop.eup %2167  ;;  %v1118_v0 = vmul.f32 1.442695, %v2166_v61 }
 0x1c1   : > { %2173 = vpow2.f32 %v1120_v60  ;;  %v1327_v14 = vrot.slane %v1168_v58, %v2355_v52 }
 0x1c2   : > { %1237 = vperm.xlu1 %2109, %v2168_v62   ;;  %2175 = vpow2.f32 %v1104_v59  ;;  %v2170_v2 = vpop.eup %2169  ;;  %v1219_v59 = vcombine.high %v2504_v50, %v2504_v50  ;;  %v1347_v62 = vrot.slane %v1218_v47, %v2355_v52 }
 0x1c3   : > { %2177 = vpow2.f32 %v1118_v0  ;;  %v2172_v6 = vpop.eup %2171 }
 0x1c4   : > { %v1363_v15 = vrot.slane %v1219_v59, %v2355_v52 }
 0x1c6   : > { %1247 = vperm.xlu1 %2109, %v2170_v2   ;;  %v1315_v2 = vrot.slane %v1169_v53, %v2355_v52 }
 0x1c8   : > { %v2046_v1 = vpop.f32.mrb[0].mxu1 }
 0x1c9   : > { %v605_v3 = vadd.f32 %v2046_v1, %v1982_v63  ;;  %v599_v4 = vpop.f32.mrb[1].mxu1  ;;  %v1355_v1 = vrot.slane %v2504_v50, %v2355_v52 }
 0x1ca   : > { %v600_v5 = vadd.f32 %v1982_v63, %v599_v4  ;;  %1252 = vperm.xlu1 %2109, %v2172_v6   ;;  %v1311_v63 = vrot.slane %v1167_v48, %v2355_v52  ;;  %v1319_v6 = vrot.slane %v2507_v51, %v2355_v52 }
 0x1cb   : > { %609 = vst.msk [vmem:[%s399_s12 + $0x8] sm:$0xff] %vm427_vm0, %v605_v3  ;;  %v2174_v7 = vpop.eup %2173  ;;  %v1217_v3 = vcombine.high %v2489_v38, %v2489_v38 }
 0x1cc   : > { %608 = vst.msk [vmem:[%s399_s12] sm:$0xff] %vm427_vm0, %v600_v5  ;;  %1297 = vperm.xlu0 %2110, %v2174_v7   ;;  %v2176_v8 = vpop.eup %2175 }
 0x1cd   : > { %v2178_v11 = vpop.eup %2177  ;;  %v2555_v25 = vrot.slane %v1217_v3, %v2355_v52 }
 0x1ce   : > { %1257 = vperm.xlu1 %2109, %v2176_v8   ;;  %v2541_v8 = vsub.s32 %v1464_v57, %v2343_v42 }
 0x1d2   : > { %1292 = vperm.xlu1 %2109, %v2178_v11   ;;  %v1323_v11 = vrot.slane %v2512_v54, %v2355_v52 }
 0x229   : > { %v2461_v12 = vpop.permute.xlu1 %1262 }
 0x22a   : > { %v2481_v30 = vpop.permute.xlu0 %1222  ;;  %v1388_v4 = vmul.f32 %v1335_v18, %v2461_v12  ;;  %v1766_v5 = vrot.slane %v2461_v12, %v2486_v35 }
 0x22b   : > { %v1380_v26 = vmul.f32 %v1303_v41, %v2481_v30 }
 0x22d   : > { %v2463_v13 = vpop.permute.xlu1 %1272 }
 0x22e   : > { %v1268_v49 = vpop.permute.xlu0 %1267  ;;  %v1390_v60 = vmul.f32 %v1343_v44, %v2463_v13  ;;  %v1774_v42 = vrot.slane %v2463_v13, %v2486_v35  ;;  %v1734_v13 = vrot.slane %v2481_v30, %v2486_v35 }
 0x22f   : > { %v1770_v61 = vrot.slane %v1268_v49, %v2486_v35  ;;  %v1389_v27 = vmul.f32 %v1339_v46, %v1268_v49 }
 0x230   : > { %v1532_v20 = vcombine.low %v1388_v4, %v1390_v60  ;;  %v1533_v23 = vcombine.high %v1388_v4, %v1390_v60 }
 0x231   : > { %v2469_v16 = vpop.permute.xlu1 %1282  ;;  %v1809_v21 = vsel %vm1795_vm3, %v1770_v61, %v1766_v5 }
 0x232   : > { %v1810_v32 = vsel %vm1797_vm4, %v1774_v42, %v1809_v21  ;;  %v2566_v33 = vrot.slane %v1532_v20, %v2500_v45  ;;  %v2570_v39 = vrot.slane %v1533_v23, %v2500_v45  ;;  %v1782_v30 = vrot.slane %v2469_v16, %v2486_v35 }
 0x233   : > { %v1392_v41 = vmul.f32 %v1351_v19, %v2469_v16 }
 0x235   : > { %v2478_v10 = vpop.permute.xlu1 %1227 }
 0x236   : > { %v1738_v24 = vrot.slane %v2478_v10, %v2486_v35  ;;  %v1381_v40 = vmul.f32 %v1307_v55, %v2478_v10 }
 0x238   : > { %v1278_v0 = vpop.permute.xlu0 %1277  ;;  %v1796_v18 = vsel %vm1795_vm3, %v1738_v24, %v1734_v13 }
 0x239   : > { %v2494_v37 = vpop.permute.xlu1 %1232  ;;  %v1391_v12 = vmul.f32 %v1347_v62, %v1278_v0  ;;  %v1778_v22 = vrot.slane %v1278_v0, %v2486_v35 }
 0x23a   : > { %v1382_v28 = vmul.f32 %v1311_v63, %v2494_v37  ;;  %v1742_v29 = vrot.slane %v2494_v37, %v2486_v35 }
 0x23b   : > { %v1548_v34 = vcombine.low %v1389_v27, %v1391_v12  ;;  %v1549_v38 = vcombine.high %v1389_v27, %v1391_v12  ;;  %v1811_v36 = vsel %vm1799_vm5, %v1778_v22, %v1810_v32 }
 0x23c   : > { %v1288_v37 = vpop.permute.xlu0 %1287  ;;  %v1396_v44 = vcombine.low %v1380_v26, %v1382_v28  ;;  %v1397_v46 = vcombine.high %v1380_v26, %v1382_v28  ;;  %v1798_v47 = vsel %vm1797_vm4, %v1742_v29, %v1796_v18  ;;  %v1812_v49 = vsel %vm1801_vm6, %v1782_v30, %v1811_v36 }
 0x23d   : > { %v2518_v56 = vpop.permute.xlu1 %1242  ;;  %v2582_v54 = vrot.slane %v1548_v34, %v2500_v45  ;;  %v2585_v10 = vrot.slane %v1549_v38, %v2500_v45  ;;  %v1393_v57 = vmul.f32 %v1355_v1, %v1288_v37  ;;  %v1786_v58 = vrot.slane %v1288_v37, %v2486_v35 }
 0x23e   : > { %v1750_v16 = vrot.slane %v2518_v56, %v2486_v35  ;;  %v2592_v60 = vrot.slane %v1396_v44, %v2500_v45  ;;  %v2595_v61 = vrot.slane %v1397_v46, %v2500_v45  ;;  %v1384_v62 = vmul.f32 %v1319_v6, %v2518_v56 }
 0x23f   : > { %v1596_v6 = vcombine.low %v2566_v33, %v2582_v54 }
 0x241   : > { %v1238_v7 = vpop.permute.xlu1 %1237 }
 0x242   : > { %v1383_v9 = vmul.f32 %v1315_v2, %v1238_v7  ;;  %v1746_v52 = vrot.slane %v1238_v7, %v2486_v35 }
 0x244   : > { %v1413_v50 = vcombine.high %v1381_v40, %v1383_v9  ;;  %v1800_v51 = vsel %vm1799_vm5, %v1746_v52, %v1798_v47  ;;  %v1412_v2 = vcombine.low %v1381_v40, %v1383_v9 }
 0x245   : > { %v1248_v31 = vpop.permute.xlu1 %1247  ;;  %v1802_v63 = vsel %vm1801_vm6, %v1750_v16, %v1800_v51  ;;  %v2649_v16 = vrot.slane %v1596_v6, %v2541_v8 }
 0x246   : > { %v1754_v53 = vrot.slane %v1248_v31, %v2486_v35  ;;  %v2600_v3 = vrot.slane %v1413_v50, %v2500_v45  ;;  %v1385_v1 = vmul.f32 %v1323_v11, %v1248_v31  ;;  %v1420_v24 = vrot.slane %v1412_v2, %v2500_v45 }
 0x248   : > { %v1804_v4 = vsel %vm1803_vm7, %v1754_v53, %v1802_v63 }
 0x249   : > { %v1253_v48 = vpop.permute.xlu1 %1252 }
 0x24a   : > { %v1386_v19 = vmul.f32 %v1327_v14, %v1253_v48  ;;  %v1758_v59 = vrot.slane %v1253_v48, %v2486_v35  ;;  %v1460_v48 = vcombine.low %v2592_v60, %v1420_v24 }
 0x24b   : > { %v1298_v55 = vpop.permute.xlu0 %1297 }
 0x24c   : > { %v1395_v43 = vmul.f32 %v1363_v15, %v1298_v55  ;;  %v1428_v5 = vcombine.low %v1384_v62, %v1386_v19  ;;  %v1429_v7 = vcombine.high %v1384_v62, %v1386_v19  ;;  %v1813_v15 = vsel %vm1803_vm7, %v1786_v58, %v1812_v49 }
 0x24d   : > { %v1258_v0 = vpop.permute.xlu1 %1257  ;;  %v1806_v11 = vsel %vm1805_vm8, %v1758_v59, %v1804_v4  ;;  %v1794_v32 = vrot.slane %v1298_v55, %v2486_v35  ;;  %v1477_v58 = vcombine.high %v2595_v61, %v2600_v3  ;;  %v1597_v4 = vcombine.high %v2566_v33, %v2582_v54 }
 0x24e   : > { %v1387_v14 = vmul.f32 %v1331_v17, %v1258_v0  ;;  %v1762_v56 = vrot.slane %v1258_v0, %v2486_v35  ;;  %v1580_v20 = vcombine.low %v1393_v57, %v1395_v43  ;;  %v1581_v21 = vcombine.high %v1393_v57, %v1395_v43 }
 0x24f   : > { %v1476_v17 = vcombine.low %v2595_v61, %v2600_v3  ;;  %v1436_v28 = vrot.slane %v1428_v5, %v2500_v45  ;;  %v1443_v29 = vrot.slane %v1429_v7, %v2500_v45  ;;  %v1468_v0 = vrot.slane %v1460_v48, %v2541_v8 }
 0x250   : > { %v1444_v12 = vcombine.low %v1385_v1, %v1387_v14  ;;  %v1445_v22 = vcombine.high %v1385_v1, %v1387_v14  ;;  %v1808_v23 = vsel %vm1807_vm9, %v1762_v56, %v1806_v11  ;;  %v1588_v38 = vrot.slane %v1580_v20, %v2500_v45 }
 0x251   : > { %v1293_v42 = vpop.permute.xlu1 %1292  ;;  %1819 = vst.msk [vmem:[%s2607_s17] sm:$0xff] %vm1818_vm10, %v1808_v23  ;;  %v2639_v46 = vrot.slane %v1476_v17, %v2541_v8  ;;  %v1491_v7 = vrot.slane %v1477_v58, %v2541_v8  ;;  %v1613_v11 = vcombine.high %v2570_v39, %v2585_v10  ;;  %v1611_v33 = vrot.slane %v1597_v4, %v2541_v8 }
 0x252   : > { %v1394_v26 = vmul.f32 %v2555_v25, %v1293_v42  ;;  %v1790_v27 = vrot.slane %v1293_v42, %v2486_v35  ;;  %v1452_v31 = vrot.slane %v1444_v12, %v2500_v45  ;;  %v1459_v13 = vrot.slane %v1445_v22, %v2500_v45 }
 0x253   : > { %v1595_v25 = vrot.slane %v1581_v21, %v2500_v45  ;;  %v1612_v35 = vcombine.low %v2570_v39, %v2585_v10  ;;  %v1627_v12 = vrot.slane %v1613_v11, %v2541_v8 }
 0x254   : > { %v1564_v9 = vcombine.low %v1392_v41, %v1394_v26  ;;  %v1565_v52 = vcombine.high %v1392_v41, %v1394_v26  ;;  %v1814_v34 = vsel %vm1805_vm8, %v1790_v27, %v1813_v15  ;;  %v1493_v36 = vcombine.high %v1436_v28, %v1452_v31 }
 0x255   : > { %v1508_v37 = vcombine.low %v1443_v29, %v1459_v13  ;;  %v1492_v30 = vcombine.low %v1436_v28, %v1452_v31  ;;  %v1815_v44 = vsel %vm1807_vm9, %v1794_v32, %v1814_v34  ;;  %v1461_v41 = vcombine.high %v2592_v60, %v1420_v24 }
 0x256   : > { %v1572_v40 = vrot.slane %v1564_v9, %v2500_v45  ;;  %v1579_v18 = vrot.slane %v1565_v52, %v2500_v45  ;;  %1820 = vst.msk [vmem:[%s2607_s17 + $0x8] sm:$0xff] %vm1818_vm10, %v1815_v44  ;;  %v1509_v45 = vcombine.high %v1443_v29, %v1459_v13  ;;  %v1507_v53 = vrot.slane %v1493_v36, %v2541_v8 }
 0x257   : > { %v2642_v47 = vrot.slane %v1508_v37, %v2541_v8  ;;  %v2658_v57 = vrot.slane %v1492_v30, %v2541_v8  ;;  %v1475_v59 = vrot.slane %v1461_v41, %v2541_v8  ;;  %v1620_v43 = vrot.slane %v1612_v35, %v2541_v8 }
 0x258   : > { %v1628_v49 = vcombine.low %v1572_v40, %v1588_v38  ;;  %v1644_v50 = vcombine.low %v1579_v18, %v1595_v25  ;;  %v1629_v62 = vcombine.high %v1572_v40, %v1588_v38  ;;  %v1523_v1 = vrot.slane %v1509_v45, %v2541_v8 }
 0x259   : > { %v1529_v51 = vcombine.high %v2639_v46, %v2642_v47  ;;  %v1528_v60 = vcombine.low %v2639_v46, %v2642_v47  ;;  %v1526_v2 = vcombine.low %v1475_v59, %v1507_v53  ;;  %v1524_v5 = vcombine.low %v1468_v0, %v2658_v57 }
 0x25a   : > { %v2652_v19 = vrot.slane %v1628_v49, %v2541_v8  ;;  %v2655_v55 = vrot.slane %v1644_v50, %v2541_v8  ;;  %v1645_v14 = vcombine.high %v1579_v18, %v1595_v25  ;;  %v1643_v6 = vrot.slane %v1629_v62, %v2541_v8 }
 0x25b   : > { %1694 = vrot.lane.b32.xlu0 %v1529_v51, %s2191_s28  ;;  %v1530_v15 = vcombine.low %v1491_v7, %v1523_v1  ;;  %v1527_v21 = vcombine.high %v1475_v59, %v1507_v53  ;;  %v1531_v23 = vcombine.high %v1491_v7, %v1523_v1  ;;  %v1525_v39 = vcombine.high %v1468_v0, %v2658_v57 }
 0x25c   : > { %v1661_v63 = vcombine.high %v2649_v16, %v2652_v19  ;;  %v1660_v61 = vcombine.low %v2649_v16, %v2652_v19  ;;  %v1664_v3 = vcombine.low %v1620_v43, %v2655_v55  ;;  %v1665_v56 = vcombine.high %v1620_v43, %v2655_v55 }
 0x25d   : > { %v1662_v54 = vcombine.low %v1611_v33, %v1643_v6  ;;  %v1659_v20 = vrot.slane %v1645_v14, %v2541_v8  ;;  %v1663_v42 = vcombine.high %v1611_v33, %v1643_v6 }
 0x25e   : > { %1672 = vrot.lane.b32.xlu1 %v1661_v63, %s2191_s28 }
 0x25f   : > { %1678 = vrot.lane.b32.xlu0 %v1526_v2, %s2192_s18  ;;  %v1666_v22 = vcombine.low %v1627_v12, %v1659_v20  ;;  %v1667_v10 = vcombine.high %v1627_v12, %v1659_v20 }
 0x262   : > { %1696 = vrot.lane.b32.xlu1 %v1665_v56, %s2191_s28 }
 0x263   : > { %1702 = vrot.lane.b32.xlu0 %v1530_v15, %s2192_s18 }
 0x266   : > { %1680 = vrot.lane.b32.xlu1 %v1662_v54, %s2192_s18 }
 0x267   : > { %1686 = vrot.lane.b32.xlu0 %v1527_v21, %s2193_s19 }
 0x26a   : > { %1704 = vrot.lane.b32.xlu1 %v1666_v22, %s2192_s18 }
 0x26b   : > { %1710 = vrot.lane.b32.xlu0 %v1531_v23, %s2193_s19 }
 0x26e   : > { %1670 = vrot.lane.b32.xlu1 %v1525_v39, %s2191_s28 }
 0x26f   : > { %1712 = vrot.lane.b32.xlu0 %v1667_v10, %s2193_s19 }
 0x272   : > { %1688 = vrot.lane.b32.xlu1 %v1663_v42, %s2193_s19 }
 0x2cd   : > { %v1695_v24 = vpop.permute.xlu0 %1694 }
 0x2ce   : > { %v1723_v31 = vsel %vm427_vm0, %v1528_v60, %v1695_v24 }
 0x2d0   : > { %v1673_v17 = vpop.permute.xlu1 %1672 }
 0x2d1   : > { %v1679_v26 = vpop.permute.xlu0 %1678  ;;  %v1717_v18 = vsel %vm427_vm0, %v1660_v61, %v1673_v17 }
 0x2d4   : > { %v1697_v27 = vpop.permute.xlu1 %1696 }
 0x2d5   : > { %v1703_v8 = vpop.permute.xlu0 %1702  ;;  %v1724_v34 = vsel %vm427_vm0, %v1664_v3, %v1697_v27 }
 0x2d6   : > { %v1725_v32 = vsel %vm526_vm2, %v1723_v31, %v1703_v8 }
 0x2d8   : > { %v1681_v28 = vpop.permute.xlu1 %1680 }
 0x2d9   : > { %v1687_v29 = vpop.permute.xlu0 %1686  ;;  %v1719_v35 = vsel %vm526_vm2, %v1717_v18, %v1681_v28 }
 0x2dc   : > { %v1705_v13 = vpop.permute.xlu1 %1704 }
 0x2dd   : > { %v1711_v9 = vpop.permute.xlu0 %1710  ;;  %v1726_v25 = vsel %vm526_vm2, %v1724_v34, %v1705_v13 }
 0x2de   : > { %v1727_v52 = vsel %vm1720_vm11, %v1725_v32, %v1711_v9 }
 0x2df   : > { %1822 = vst [vmem:[%s412_s24 + $0x8] sm:$0xff] %v1727_v52 }
 0x2e0   : > { %v1671_v38 = vpop.permute.xlu1 %1670 }
 0x2e1   : > { %v1713_v36 = vpop.permute.xlu0 %1712  ;;  %v1716_v37 = vsel %vm427_vm0, %v1524_v5, %v1671_v38 }
 0x2e2   : > { %v1728_v30 = vsel %vm1720_vm11, %v1726_v25, %v1713_v36  ;;  %v1718_v40 = vsel %vm526_vm2, %v1716_v37, %v1679_v26 }
 0x2e3   : > { %1824 = vst [vmem:[%s412_s24 + $0x18] sm:$0xff] %v1728_v30  ;;  %v1721_v44 = vsel %vm1720_vm11, %v1718_v40, %v1687_v29 }
 0x2e4   : > { %1821 = vst [vmem:[%s412_s24] sm:$0xff] %v1721_v44  ;;  %v1689_v41 = vpop.permute.xlu1 %1688 }
 0x2e5   : > { %v1722_v46 = vsel %vm1720_vm11, %v1719_v35, %v1689_v41 }
 0x2e6   : > { %1823 = vst [vmem:[%s412_s24 + $0x10] sm:$0xff] %v1722_v46 }
 0x2e7 PF: > { %s21_s13 = sadd.s32 1, %s2185_s13  }
 0x2e8   : > { %p18_p5 = scmp.ge.s32.totalorder %s21_s13, 4  }
 0x2ea   :  { %20 = sbr.rel (!%p18_p5) target bundleno = 1 (0x1), region = 109 }

</bundles_post_ra>
